<compile_context>
chip_gen: v6e
topology: v6e:2x2x1
jax: 0.10.0
libtpu: 0.0.40
codegen_flags: <defaults>
</compile_context>

<pallas_src>
import functools

import jax
import jax.numpy as jnp
from jax.experimental import pallas as pl
from jax.experimental.pallas import tpu as pltpu


# -----------------------------------------------------------------------------
# Polynomial recurrences (trace-time unrolled; degree / poly_type are static).
# All families are two-term recurrences, so we only ever need P_{n-1}, P_{n-2}.
# -----------------------------------------------------------------------------
def _poly_first_two(t, degree, poly_type, alpha, beta):
    one = jnp.ones_like(t)
    p0 = jnp.zeros_like(t) if poly_type == "fibonacci" else one
    if degree == 0:
        return p0, None
    if poly_type == "chebyshev":
        # torch computes cos(d*acos(t)); since t = tanh(x) in (-1,1) this equals T_d(t),
        # so the standard three-term recurrence is numerically equivalent (and VPU-cheap).
        p1 = t
    elif poly_type == "bessel":
        p1 = t + 1.0
    elif poly_type == "fibonacci":
        p1 = one
    elif poly_type == "gegenbauer":
        p1 = 2.0 * alpha * t
    elif poly_type == "hermite":
        p1 = 2.0 * t
    elif poly_type == "jacobi":
        p1 = 0.5 * (alpha - beta) + (alpha + beta + 2.0) * t / 2.0
    elif poly_type == "laguerre":
        p1 = 1.0 + alpha - t
    elif poly_type == "legendre":
        p1 = t
    else:
        raise ValueError(f"unknown poly_type {poly_type!r}")
    return p0, p1


def _poly_next(n, t, p_nm1, p_nm2, poly_type, alpha, beta):
    """P_n for n >= 2 from P_{n-1}, P_{n-2} (matches the torch recurrences)."""
    if poly_type == "chebyshev":
        return 2.0 * t * p_nm1 - p_nm2
    if poly_type == "bessel":
        return (2.0 * n - 1.0) * t * p_nm1 + p_nm2
    if poly_type == "fibonacci":
        return t * p_nm1 + p_nm2
    if poly_type == "gegenbauer":
        m = n - 1.0  # torch loop variable
        return (2.0 * (m + alpha) * t * p_nm1 - (m + 2.0 * alpha - 1.0) * p_nm2) / (m + 1.0)
    if poly_type == "hermite":
        return 2.0 * t * p_nm1 - 2.0 * (n - 1.0) * p_nm2
    if poly_type == "jacobi":
        A_n = 2.0 * n * (n + alpha + beta) * (2.0 * n + alpha + beta - 2.0)
        term1 = ((2.0 * n + alpha + beta - 1.0) * (2.0 * n + alpha + beta)
                 * (2.0 * n + alpha + beta - 2.0)) * t * p_nm1
        term2 = (2.0 * n + alpha + beta - 1.0) * (alpha ** 2 - beta ** 2) * p_nm1
        term3 = ((n + alpha + beta - 1.0) * (n + alpha - 1.0) * (n + beta - 1.0)
                 * (2.0 * n + alpha + beta)) * p_nm2
        return (term1 - term2 - term3) / A_n
    if poly_type == "laguerre":
        return ((2.0 * (n - 1.0) + 1.0 + alpha - t) * p_nm1 - (n - 1.0 + alpha) * p_nm2) / n
    if poly_type == "legendre":
        return ((2.0 * (n - 1.0) + 1.0) / n) * t * p_nm1 - ((n - 1.0) / n) * p_nm2
    raise ValueError(f"unknown poly_type {poly_type!r}")


# -----------------------------------------------------------------------------
# Pallas kernel: tanh -> polynomial expansion -> interleaved (or fused) MXU matmul.
#   x_ref: (tbs, pack*I)   w_ref: ((degree+1)*pack*I, pack*O)   o_ref: (tbs, pack*O)
# -----------------------------------------------------------------------------
def _kan_kernel(x_ref, w_ref, o_ref, *, degree, poly_type, alpha, beta, k_chunk, fuse):
    t = jnp.tanh(x_ref[...].astype(jnp.float32))
    p_prev2, p_prev1 = _poly_first_two(t, degree, poly_type, alpha, beta)
    mxu_dtype = w_ref.dtype

    if fuse:
        # Build all degree+1 bases (already narrowed to the MXU dtype) and do ONE matmul
        # with K = (degree+1)*pack*I.  Only used when per-degree K is small.
        basis = [p_prev2.astype(mxu_dtype)]
        if degree >= 1:
            basis.append(p_prev1.astype(mxu_dtype))
        for n in range(2, degree + 1):
            p_n = _poly_next(n, t, p_prev1, p_prev2, poly_type, alpha, beta)
            basis.append(p_n.astype(mxu_dtype))
            p_prev2, p_prev1 = p_prev1, p_n
        lhs = basis[0] if len(basis) == 1 else jnp.concatenate(basis, axis=-1)
        acc = jnp.dot(lhs, w_ref[...], preferred_element_type=jnp.float32)
    else:
        # Interleaved: keep only P_{n-1}, P_{n-2} live; accumulate per-degree matmuls
        # against static row-slices of the packed weight (zero-cost ref slicing).
        acc = jnp.dot(p_prev2.astype(mxu_dtype), w_ref[0:k_chunk, :],
                      preferred_element_type=jnp.float32)
        if degree >= 1:
            acc += jnp.dot(p_prev1.astype(mxu_dtype), w_ref[k_chunk:2 * k_chunk, :],
                           preferred_element_type=jnp.float32)
        for n in range(2, degree + 1):
            p_n = _poly_next(n, t, p_prev1, p_prev2, poly_type, alpha, beta)
            acc += jnp.dot(p_n.astype(mxu_dtype),
                           w_ref[n * k_chunk:(n + 1) * k_chunk, :],
                           preferred_element_type=jnp.float32)
            p_prev2, p_prev1 = p_prev1, p_n

    o_ref[...] = acc.astype(o_ref.dtype)


# -----------------------------------------------------------------------------
# Weight packing (one-time, outside the per-call path)
# -----------------------------------------------------------------------------
def _choose_pack(output_dim):
    """How many batch rows share one lane-dense output row (pack*O == 128 when possible).
    NOTE: if output_dim does not divide 128 we fall back to pack=1, which reintroduces
    masked sub-128-lane output stores (perf cliff, not a correctness issue)."""
    if output_dim < 128 and 128 % output_dim == 0:
        return 128 // output_dim
    return 1


def pack_kan_coeffs(coeffs_iod, dtype=jnp.bfloat16):
    """One-time conversion of the torch-layout parameter (I, O, degree+1) into the
    kernel's fused, slab-packed weight ((degree+1)*pack*I, pack*O).
    W[(d, j, i), (k, o)] = coeffs[i, o, d] if j == k else 0.
    bf16 default: f32 weights force the MXU into multi-pass f32 mode and double VMEM."""
    input_dim, output_dim, dp1 = coeffs_iod.shape
    pack = _choose_pack(output_dim)
    c_dio = jnp.transpose(coeffs_iod, (2, 0, 1)).astype(jnp.float32)      # (D+1, I, O)
    eye = jnp.eye(pack, dtype=jnp.float32)                                # (pack, pack)
    w = jnp.einsum("dio,jk->djiko", c_dio, eye)                           # (D+1,pack,I,pack,O)
    return w.reshape(dp1 * pack * input_dim, pack * output_dim).astype(dtype)


# -----------------------------------------------------------------------------
# Single pallas_call on a pack-aligned batch (B % pack == 0)
# -----------------------------------------------------------------------------
def _kan_call(x2, w_packed, *, pack, input_dim, output_dim, degree, poly_type,
              alpha, beta, block_rows, fuse, out_dtype):
    B = x2.shape[0]
    assert B % pack == 0
    Bs = B // pack
    k_chunk = pack * input_dim
    n_out = pack * output_dim
    x_slab = x2.reshape(Bs, k_chunk)               # free row-major reshape

    # ---- batch tile (slab rows) --------------------------------------------------
    tbs = min(max(1, block_rows // pack), Bs)
    if Bs >= 16:
        # Ensure >= 2 grid blocks so v7x's second TensorCore gets work.
        tbs = min(tbs, ((Bs + 1) // 2 + 7) // 8 * 8)
    if tbs != Bs:
        tbs = max(8, (tbs // 8) * 8)               # sublane rule for partial-grid blocks
        tbs = min(tbs, Bs)

    # ---- VMEM footprint / limit --------------------------------------------------
    def footprint(t):
        n_basis = (degree + 2) if fuse else 3       # live f32 basis temporaries
        x_bytes = 2 * t * k_chunk * x_slab.dtype.itemsize          # double-buffered in
        o_bytes = 2 * t * n_out * jnp.dtype(out_dtype).itemsize    # double-buffered out
        w_bytes = 2 * w_packed.size * w_packed.dtype.itemsize      # double-buffered weight
        tmp = 4 * t * (n_basis * k_chunk + n_out)                  # f32 temporaries + acc
        return x_bytes + o_bytes + w_bytes + tmp

    BUDGET = 40 * 1024 * 1024                       # keep under v7x's 64 MiB with margin
    while tbs > 8 and footprint(tbs) > BUDGET:
        tbs = max(8, (tbs // 2 // 8) * 8)
    vmem_limit = int(min(48 * 1024 * 1024,
                         max(32 * 1024 * 1024, footprint(tbs) * 1.5 + (4 << 20))))

    grid = (pl.cdiv(Bs, tbs),)                      # partial last block is masked by Pallas

    kernel = functools.partial(
        _kan_kernel, degree=degree, poly_type=poly_type, alpha=alpha, beta=beta,
        k_chunk=k_chunk, fuse=fuse)

    out = pl.pallas_call(
        kernel,
        out_shape=jax.ShapeDtypeStruct((Bs, n_out), out_dtype),
        grid_spec=pltpu.PrefetchScalarGridSpec(
            num_scalar_prefetch=0,
            grid=grid,
            in_specs=[
                pl.BlockSpec((tbs, k_chunk), lambda i: (i, 0)),
                # Constant (grid-invariant) weight block, resident across the grid.
                # TODO(synk): pipeline_mode=pl.Buffered(1) + N/K tiling for large coeffs.
                pl.BlockSpec(((degree + 1) * k_chunk, n_out), lambda i: (0, 0)),
            ],
            out_specs=pl.BlockSpec((tbs, n_out), lambda i: (i, 0)),
        ),
        compiler_params=pltpu.CompilerParams(
            dimension_semantics=("parallel",),
            vmem_limit_bytes=vmem_limit),
    )(x_slab, w_packed)

    # Free metadata reshape: (Bs, pack*O) row-major == (Bs*pack, O).
    return out.reshape(-1, output_dim)


# -----------------------------------------------------------------------------
# Public wrapper
# -----------------------------------------------------------------------------
def kan_layer(x, w_packed, *, input_dim, output_dim, degree, poly_type,
              alpha=None, beta=None, block_rows=8192, fuse_matmul=None,
              out_dtype=jnp.float32):
    """Pallas KAN layer forward.  x: any shape whose size is divisible by input_dim.
    w_packed: output of pack_kan_coeffs (pre-stored kernel-friendly weight layout).
    Set out_dtype=jnp.bfloat16 (and feed bf16 x) when the surrounding network is bf16."""
    if poly_type in ("gegenbauer", "jacobi", "laguerre"):
        assert alpha is not None, f"poly_type={poly_type!r} requires alpha"
    if poly_type == "jacobi":
        assert beta is not None, "poly_type='jacobi' requires beta"

    pack = _choose_pack(output_dim)
    k_chunk = pack * input_dim
    assert w_packed.shape == ((degree + 1) * k_chunk, pack * output_dim), w_packed.shape

    if fuse_matmul is None:
        # Interleaved whenever per-degree K already feeds the MXU well; the fused
        # single-matmul only pays off for tiny per-degree K and modest total K.
        fuse_matmul = (k_chunk < 256) and ((degree + 1) * k_chunk <= 4096)

    # NOTE: no dtype cast of x here — the kernel casts; HBM traffic stays in x's dtype.
    x2 = x.reshape(-1, input_dim)
    B = x2.shape[0]

    call = functools.partial(
        _kan_call, w_packed=w_packed, pack=pack, input_dim=input_dim,
        output_dim=output_dim, degree=degree, poly_type=poly_type, alpha=alpha,
        beta=beta, block_rows=block_rows, fuse=fuse_matmul, out_dtype=out_dtype)

    # Avoid a full-array pad for ragged B: pack-aligned bulk in one call, the < pack
    # leftover rows in a second tiny call with a tiny pad.
    B_main = (B // pack) * pack
    outs = []
    if B_main:
        outs.append(call(x2[:B_main]))
    if B_main < B:
        tail = x2[B_main:]
        tail = jnp.pad(tail, ((0, pack - (B - B_main)), (0, 0)))   # pads < pack rows only
        outs.append(call(tail)[: B - B_main])
    return outs[0] if len(outs) == 1 else jnp.concatenate(outs, axis=0)


# -----------------------------------------------------------------------------
# Pure-JAX reference (mirrors the torch forward, incl. cos(d*acos) for chebyshev)
# -----------------------------------------------------------------------------
def kan_reference(x, coeffs_iod, *, degree, poly_type, alpha=None, beta=None):
    input_dim = coeffs_iod.shape[0]
    t = jnp.tanh(x.reshape(-1, input_dim).astype(jnp.float32))
    if poly_type == "chebyshev":
        d_range = jnp.arange(degree + 1, dtype=jnp.float32)
        basis = jnp.cos(jnp.arccos(t)[..., None] * d_range)         # (B, I, D+1)
    else:
        p0, p1 = _poly_first_two(t, degree, poly_type, alpha, beta)
        ps = [p0] + ([p1] if degree >= 1 else [])
        for n in range(2, degree + 1):
            ps.append(_poly_next(n, t, ps[-1], ps[-2], poly_type, alpha, beta))
        basis = jnp.stack(ps, axis=-1)
    return jnp.einsum("bid,iod->bo", basis, coeffs_iod.astype(jnp.float32))


# -----------------------------------------------------------------------------
if __name__ == "__main__":
    key = jax.random.PRNGKey(0)
    k1, k2, k3, k4, k5, k6 = jax.random.split(key, 6)

    # ---- test 1: chebyshev, bf16 weights; exercises BOTH the interleaved and fused paths
    input_dim, output_dim, degree = 16, 8, 3
    x = jax.random.normal(k1, (2, 4, 16, 16), dtype=jnp.float32)     # -> B = 128
    std = 1.0 / (input_dim * (degree + 1))
    coeffs = std * jax.random.normal(k2, (input_dim, output_dim, degree + 1), jnp.float32)
    w_bf16 = pack_kan_coeffs(coeffs, dtype=jnp.bfloat16)

    y = kan_layer(x, w_bf16, input_dim=input_dim, output_dim=output_dim,
                  degree=degree, poly_type="chebyshev")              # default: interleaved
    y = jax.block_until_ready(y)
    y_fused = kan_layer(x, w_bf16, input_dim=input_dim, output_dim=output_dim,
                        degree=degree, poly_type="chebyshev", fuse_matmul=True)
    y_fused = jax.block_until_ready(y_fused)
    y_ref = kan_reference(x, coeffs, degree=degree, poly_type="chebyshev")
    assert y.shape == (128, output_dim), y.shape
    # bf16 dot operands (f32 accumulate): loose tolerance covers the input rounding.
    assert jnp.allclose(y, y_ref, rtol=3e-2, atol=3e-3), float(jnp.max(jnp.abs(y - y_ref)))
    assert jnp.allclose(y_fused, y_ref, rtol=3e-2, atol=3e-3), \
        float(jnp.max(jnp.abs(y_fused - y_ref)))

    # ---- test 2: jacobi (alpha/beta), bf16 weights, ragged B (bulk call + tiny tail call)
    deg2 = 6
    x2 = jax.random.normal(k3, (3, 8, 16), dtype=jnp.float32)        # -> B = 24 (16 + 8 tail)
    c2 = (1.0 / (input_dim * (deg2 + 1))) * jax.random.normal(
        k4, (input_dim, output_dim, deg2 + 1), jnp.float32)
    w2 = pack_kan_coeffs(c2, dtype=jnp.bfloat16)
    y2 = kan_layer(x2, w2, input_dim=input_dim, output_dim=output_dim,
                   degree=deg2, poly_type="jacobi", alpha=1.0, beta=0.5)
    y2 = jax.block_until_ready(y2)
    y2_ref = kan_reference(x2, c2, degree=deg2, poly_type="jacobi", alpha=1.0, beta=0.5)
    assert y2.shape == (24, output_dim), y2.shape
    assert jnp.allclose(y2, y2_ref, rtol=3e-2, atol=3e-3), float(jnp.max(jnp.abs(y2 - y2_ref)))

    # ---- test 3: legendre, f32 weights (validates the wide-dtype path), tail-only batch
    deg3 = 4
    x3 = jax.random.normal(k5, (9, 16), dtype=jnp.float32)           # B = 9 (< pack)
    c3 = (1.0 / (input_dim * (deg3 + 1))) * jax.random.normal(
        k6, (input_dim, output_dim, deg3 + 1), jnp.float32)
    w3 = pack_kan_coeffs(c3, dtype=jnp.float32)
    y3 = kan_layer(x3, w3, input_dim=input_dim, output_dim=output_dim,
                   degree=deg3, poly_type="legendre")
    y3 = jax.block_until_ready(y3)
    y3_ref = kan_reference(x3, c3, degree=deg3, poly_type="legendre")
    assert y3.shape == (9, output_dim), y3.shape
    assert jnp.allclose(y3, y3_ref, rtol=1e-4, atol=1e-5), float(jnp.max(jnp.abs(y3 - y3_ref)))

    print("KERNEL_OK")
</pallas_src>

<mosaic_0001>
module attributes {stable_mosaic.version = 11 : i64} {
  func.func @_kan_kernel(%arg0: i32, %arg1: memref<8x256xf32, #tpu.memory_space<vmem>>, %arg2: memref<1024x128xbf16, #tpu.memory_space<vmem>>, %arg3: memref<8x128xf32, #tpu.memory_space<vmem>>) attributes {dimension_semantics = [#tpu.dimension_semantics<parallel>], iteration_bounds = array<i64: 1>, scalar_prefetch = 0 : i64, scratch_operands = 0 : i64, tpu.core_type = #tpu.core_type<tc>, window_params = [{transform_indices = @transform_0, window_bounds = array<i64: 8, 256>}, {pipeline_mode = #tpu.pipeline_mode<synchronous>, transform_indices = @transform_1, window_bounds = array<i64: 1024, 128>}, {transform_indices = @transform_2, window_bounds = array<i64: 8, 128>}]} {
    %c0 = arith.constant 0 : index
    %c0_0 = arith.constant 0 : index
    %0 = vector.load %arg1[%c0, %c0_0] : memref<8x256xf32, #tpu.memory_space<vmem>>, vector<8x256xf32>
    %1 = math.tanh %0 : vector<8x256xf32>
    %cst = arith.constant 1.000000e+00 : f32
    %2 = vector.broadcast %cst : f32 to vector<8x256xf32>
    %3 = arith.truncf %2 : vector<8x256xf32> to vector<8x256xbf16>
    %c0_1 = arith.constant 0 : index
    %c0_2 = arith.constant 0 : index
    %4 = vector.load %arg2[%c0_1, %c0_2] : memref<1024x128xbf16, #tpu.memory_space<vmem>>, vector<256x128xbf16>
    %cst_3 = arith.constant dense<0.000000e+00> : vector<8x128xf32>
    %5 = tpu.matmul %3, %4, %cst_3 {dimension_numbers = #tpu.dot_dimension_numbers<[1], [0], [0], [1], [0, 0, 1, 1], [], []>} : vector<8x256xbf16>, vector<256x128xbf16>, vector<8x128xf32> -> vector<8x128xf32>
    %6 = arith.truncf %1 : vector<8x256xf32> to vector<8x256xbf16>
    %c256 = arith.constant 256 : index
    %c0_4 = arith.constant 0 : index
    %7 = vector.load %arg2[%c256, %c0_4] : memref<1024x128xbf16, #tpu.memory_space<vmem>>, vector<256x128xbf16>
    %cst_5 = arith.constant dense<0.000000e+00> : vector<8x128xf32>
    %8 = tpu.matmul %6, %7, %cst_5 {dimension_numbers = #tpu.dot_dimension_numbers<[1], [0], [0], [1], [0, 0, 1, 1], [], []>} : vector<8x256xbf16>, vector<256x128xbf16>, vector<8x128xf32> -> vector<8x128xf32>
    %9 = arith.addf %5, %8 : vector<8x128xf32>
    %cst_6 = arith.constant 2.000000e+00 : f32
    %10 = vector.broadcast %cst_6 : f32 to vector<8x256xf32>
    %11 = arith.mulf %10, %1 : vector<8x256xf32>
    %12 = arith.mulf %11, %1 : vector<8x256xf32>
    %13 = arith.subf %12, %2 : vector<8x256xf32>
    %14 = arith.truncf %13 : vector<8x256xf32> to vector<8x256xbf16>
    %c512 = arith.constant 512 : index
    %c0_7 = arith.constant 0 : index
    %15 = vector.load %arg2[%c512, %c0_7] : memref<1024x128xbf16, #tpu.memory_space<vmem>>, vector<256x128xbf16>
    %cst_8 = arith.constant dense<0.000000e+00> : vector<8x128xf32>
    %16 = tpu.matmul %14, %15, %cst_8 {dimension_numbers = #tpu.dot_dimension_numbers<[1], [0], [0], [1], [0, 0, 1, 1], [], []>} : vector<8x256xbf16>, vector<256x128xbf16>, vector<8x128xf32> -> vector<8x128xf32>
    %17 = arith.addf %9, %16 : vector<8x128xf32>
    %cst_9 = arith.constant 2.000000e+00 : f32
    %18 = vector.broadcast %cst_9 : f32 to vector<8x256xf32>
    %19 = arith.mulf %18, %1 : vector<8x256xf32>
    %20 = arith.mulf %19, %13 : vector<8x256xf32>
    %21 = arith.subf %20, %1 : vector<8x256xf32>
    %22 = arith.truncf %21 : vector<8x256xf32> to vector<8x256xbf16>
    %c768 = arith.constant 768 : index
    %c0_10 = arith.constant 0 : index
    %23 = vector.load %arg2[%c768, %c0_10] : memref<1024x128xbf16, #tpu.memory_space<vmem>>, vector<256x128xbf16>
    %cst_11 = arith.constant dense<0.000000e+00> : vector<8x128xf32>
    %24 = tpu.matmul %22, %23, %cst_11 {dimension_numbers = #tpu.dot_dimension_numbers<[1], [0], [0], [1], [0, 0, 1, 1], [], []>} : vector<8x256xbf16>, vector<256x128xbf16>, vector<8x128xf32> -> vector<8x128xf32>
    %25 = arith.addf %17, %24 : vector<8x128xf32>
    %c0_12 = arith.constant 0 : index
    %c0_13 = arith.constant 0 : index
    %26 = vector.load %arg3[%c0_12, %c0_13] : memref<8x128xf32, #tpu.memory_space<vmem>>, vector<8x128xf32>
    tpu.vector_store %arg3[%c0_12, %c0_13], %25 {strides = array<i32>} : memref<8x128xf32, #tpu.memory_space<vmem>>, vector<8x128xf32>,
    return
  }
  func.func @transform_0(%arg0: i32) -> (i32, i32) {
    %c0_i32 = arith.constant 0 : i32
    %c0_i32_0 = arith.constant 0 : i32
    return %arg0, %c0_i32 : i32, i32
  }
  func.func @transform_1(%arg0: i32) -> (i32, i32) {
    %c0_i32 = arith.constant 0 : i32
    %c0_i32_0 = arith.constant 0 : i32
    %c0_i32_1 = arith.constant 0 : i32
    return %c0_i32, %c0_i32_0 : i32, i32
  }
  func.func @transform_2(%arg0: i32) -> (i32, i32) {
    %c0_i32 = arith.constant 0 : i32
    %c0_i32_0 = arith.constant 0 : i32
    return %arg0, %c0_i32 : i32, i32
  }
}

</mosaic_0001>

<bundles_post_ra>
// kernel: tpu_custom_call.1
= control target key start
LH: loop header
LB: loop body
LE: loop exit
PB: predicated region body
PF: predicated region fallthrough
CT: control target
= control target key end

     0   :  { %7 = vsyncpa [#allocation3], 0  ;;  %s1077_s0 = inlined_call_operand.hbm [shape: f32[8,256], index: 0, kind: input, shape index: {}]   ;;  %s1078_s1 = inlined_call_operand.hbm [shape: bf16[1024,128], index: 1, kind: input, shape index: {}]   ;;  %s1079_s2 = inlined_call_operand.hbm [shape: f32[8,128], index: 2, kind: output, shape index: {}]  }
   0x1   :  { %8 = vsyncpa [#allocation6], 0 }
   0x2   :  { %9 = vsyncpa [#allocation4], 0  ;;  %s1045_s9 = smov [#allocation2]   ;;  %s1046_s11 = smov [#allocation5]  }
   0x3   :  { %s16_s10 = sshll.u32 %s1045_s9, 4  ;;  %s25_s12 = sshll.u32 %s1046_s11, 4  ;;  %s17_s10 = int_to_ptr.vmem [resolvable:$true] %s16_s10  ;;  %s26_s12 = int_to_ptr.vmem [resolvable:$true] %s25_s12 }
   0x4   :  { %s987_s13 = scalar_lea.vmem %s17_s10, 256  ;;  %p992_p1 = scmp.lt.s32.totalorder %s17_s10, %s17_s10 }
   0x5   :  { %p988_p0 = scmp.ne.s32.totalorder %s17_s10, %s987_s13  ;;  %p993_p2 = scmp.lt.s32.totalorder %s987_s13, %s987_s13 }
   0x7   :  { %p994_p3 = por %p993_p2, %p992_p1 }
   0x9   :  { %p995_p4 = pnand %p994_p3, %p988_p0 }
   0xb   :  { %998 = shalt.err (!%p995_p4)
}
   0xc   :  { %19 = dma.hbm_to_vmem [thread:$0]  %s1077_s0, 256, %s17_s10, [#allocation3]  }
   0xd   :  { %s1007_s16 = scalar_lea.vmem %s26_s12, 8192  ;;  %p1012_p6 = scmp.lt.s32.totalorder %s26_s12, %s26_s12 }
   0xe   :  { %p1008_p5 = scmp.ne.s32.totalorder %s26_s12, %s1007_s16  ;;  %p1013_p7 = scmp.lt.s32.totalorder %s1007_s16, %s1007_s16 }
  0x10   :  { %p1014_p8 = por %p1013_p7, %p1012_p6 }
  0x12   :  { %p1015_p9 = pnand %p1014_p8, %p1008_p5 }
  0x14   :  { %1018 = shalt.err (!%p1015_p9)
}
  0x15   :  { %s1047_s17 = smov 64   ;;  %s1048_s18 = smov 4  }
  0x16   :  { %31 = dma.hbm_to_vmem [thread:$0]  %s1078_s1, 8192, %s26_s12, [#allocation6], %s1047_s17, %s1047_s17, %s1048_s18  }
  0x17   :  { %1039 = dma.done.wait [#allocation3], 256  }
  0x18   :  { %1040 = vsyncadd [#allocation3], 4294967040 }
  0x19   :  { %1041 = dma.done.wait [#allocation6], 8192  }
  0x1a   :  { %1042 = vsyncadd [#allocation6], 4294959104  ;;  %v1049_v0 = vmov 1065369472   ;;  %v911_v1 = vld [vmem:[#allocation5 + $0xf8] sm:$0xff]   ;;  %v915_v5 = vld [vmem:[#allocation5 + $0xf0] sm:$0xff]  }
  0x1b   :  { %374 = vmatprep.mubr.bf16.mxu1 %v1049_v0  ;;  %v912_v2 = vld [vmem:[#allocation5 + $0x78] sm:$0xff]   ;;  %817 = vmatprep.subr.bf16.mxu0 %v911_v1  ;;  %v916_v6 = vld [vmem:[#allocation5 + $0x70] sm:$0xff]   ;;  %v919_v9 = vld [vmem:[#allocation5 + $0xe8] sm:$0xff]   ;;  %s1050_s0 = smov [#allocation7]  }
  0x1c   :  { %v913_v3 = vld [vmem:[#allocation5 + $0xb8] sm:$0xff]   ;;  %839 = vmatprep.subr.bf16.mxu1 %v912_v2  ;;  %v917_v7 = vld [vmem:[#allocation5 + $0xb0] sm:$0xff]   ;;  %v920_v10 = vld [vmem:[#allocation5 + $0x68] sm:$0xff]   ;;  %s741_s1 = sshll.u32 %s1050_s0, 4  ;;  %s742_s1 = int_to_ptr.vmem [resolvable:$true] %s741_s1 }
  0x1d   :  { %v914_v4 = vld [vmem:[#allocation5 + $0x38] sm:$0xff]   ;;  %818 = vmatpush3.bf16.msra.mxu0 %v913_v3  ;;  %v918_v8 = vld [vmem:[#allocation5 + $0x30] sm:$0xff]   ;;  %v921_v11 = vld [vmem:[#allocation5 + $0xa8] sm:$0xff]   ;;  %s1019_s21 = scalar_lea.vmem %s742_s1, 128  ;;  %p1024_p11 = scmp.lt.s32.totalorder %s742_s1, %s742_s1 }
  0x1e   :  { %840 = vmatpush3.bf16.msra.mxu1 %v914_v4  ;;  %819 = vmatprep.subr.bf16.mxu0 %v915_v5  ;;  %v922_v12 = vld [vmem:[#allocation5 + $0x28] sm:$0xff]   ;;  %v923_v13 = vld [vmem:[#allocation5 + $0xe0] sm:$0xff]   ;;  %v927_v17 = vld [vmem:[#allocation5 + $0xd8] sm:$0xff]   ;;  %p1020_p10 = scmp.ne.s32.totalorder %s742_s1, %s1019_s21  ;;  %p1025_p12 = scmp.lt.s32.totalorder %s1019_s21, %s1019_s21 }
  0x1f   :  { %841 = vmatprep.subr.bf16.mxu1 %v916_v6  ;;  %v924_v14 = vld [vmem:[#allocation5 + $0x60] sm:$0xff]   ;;  %v928_v18 = vld [vmem:[#allocation5 + $0x58] sm:$0xff]   ;;  %v931_v21 = vld [vmem:[#allocation5 + $0xd0] sm:$0xff]  }
  0x20   :  { %v925_v15 = vld [vmem:[#allocation5 + $0xa0] sm:$0xff]   ;;  %v929_v19 = vld [vmem:[#allocation5 + $0x98] sm:$0xff]   ;;  %v932_v22 = vld [vmem:[#allocation5 + $0x50] sm:$0xff]   ;;  %p1026_p13 = por %p1025_p12, %p1024_p11 }
  0x21   :  { %820 = vmatpush3.bf16.msra.mxu0 %v917_v7  ;;  %v926_v16 = vld [vmem:[#allocation5 + $0x20] sm:$0xff]   ;;  %v930_v20 = vld [vmem:[#allocation5 + $0x18] sm:$0xff]   ;;  %v933_v23 = vld [vmem:[#allocation5 + $0x90] sm:$0xff]  }
  0x22   :  { %842 = vmatpush3.bf16.msra.mxu1 %v918_v8  ;;  %821 = vmatprep.subr.bf16.mxu0 %v919_v9  ;;  %v934_v24 = vld [vmem:[#allocation5 + $0x10] sm:$0xff]   ;;  %v935_v25 = vld [vmem:[#allocation5 + $0xc8] sm:$0xff]   ;;  %v939_v29 = vld [vmem:[#allocation5 + $0xc0] sm:$0xff]   ;;  %p1027_p0 = pnand %p1026_p13, %p1020_p10 }
  0x23   :  { %843 = vmatprep.subr.bf16.mxu1 %v920_v10  ;;  %v936_v26 = vld [vmem:[#allocation5 + $0x48] sm:$0xff]   ;;  %v940_v30 = vld [vmem:[#allocation5 + $0x40] sm:$0xff]   ;;  %v41_v33 = vld [vmem:[#allocation2 + $0x8] sm:$0xff] }
  0x24   :  { %v937_v27 = vld [vmem:[#allocation5 + $0x88] sm:$0xff]   ;;  %v941_v31 = vld [vmem:[#allocation5 + $0x80] sm:$0xff]   ;;  %v40_v34 = vld [vmem:[#allocation2] sm:$0xff]  ;;  %975 = vtanh.f32 %v41_v33 }
  0x25   :  { %822 = vmatpush3.bf16.msra.mxu0 %v921_v11  ;;  %v938_v28 = vld [vmem:[#allocation5 + $0x8] sm:$0xff]   ;;  %v942_v32 = vld [vmem:[#allocation5] sm:$0xff]   ;;  %v943_v35 = vld [vmem:[#allocation5 + $0x178] sm:$0xff]   ;;  %977 = vtanh.f32 %v40_v34 }
  0x26   :  { %844 = vmatpush3.bf16.msra.mxu1 %v922_v12  ;;  %823 = vmatprep.subr.bf16.mxu0 %v923_v13  ;;  %v944_v36 = vld [vmem:[#allocation5 + $0x1f8] sm:$0xff]   ;;  %v948_v38 = vld [vmem:[#allocation5 + $0x1f0] sm:$0xff]   ;;  %v952_v40 = vld [vmem:[#allocation5 + $0x1e8] sm:$0xff]  }
  0x27   :  { %845 = vmatprep.subr.bf16.mxu1 %v924_v14  ;;  %v946_v37 = vld [vmem:[#allocation5 + $0x1b8] sm:$0xff]   ;;  %v950_v39 = vld [vmem:[#allocation5 + $0x1b0] sm:$0xff]   ;;  %v954_v41 = vld [vmem:[#allocation5 + $0x1a8] sm:$0xff]  }
  0x28   :  { %v945_v42 = vld [vmem:[#allocation5 + $0x138] sm:$0xff]   ;;  %v956_v44 = vld [vmem:[#allocation5 + $0x1e0] sm:$0xff]   ;;  %v947_v47 = vld [vmem:[#allocation5 + $0x170] sm:$0xff]  }
  0x29   :  { %824 = vmatpush3.bf16.msra.mxu0 %v925_v15  ;;  %v958_v50 = vld [vmem:[#allocation5 + $0x1a0] sm:$0xff]   ;;  %v949_v52 = vld [vmem:[#allocation5 + $0x130] sm:$0xff]   ;;  %v960_v54 = vld [vmem:[#allocation5 + $0x1d8] sm:$0xff]  }
  0x2a   :  { %846 = vmatpush3.bf16.msra.mxu1 %v926_v16  ;;  %825 = vmatprep.subr.bf16.mxu0 %v927_v17  ;;  %v951_v56 = vld [vmem:[#allocation5 + $0x168] sm:$0xff]   ;;  %v962_v58 = vld [vmem:[#allocation5 + $0x198] sm:$0xff]   ;;  %v964_v63 = vld [vmem:[#allocation5 + $0x1d0] sm:$0xff]  }
  0x2b   :  { %847 = vmatprep.subr.bf16.mxu1 %v928_v18  ;;  %v953_v59 = vld [vmem:[#allocation5 + $0x128] sm:$0xff]   ;;  %v966_v2 = vld [vmem:[#allocation5 + $0x190] sm:$0xff]   ;;  %v957_v3 = vld [vmem:[#allocation5 + $0x120] sm:$0xff]  }
  0x2c   :  { %v968_v6 = vld [vmem:[#allocation5 + $0x1c8] sm:$0xff]   ;;  %v959_v7 = vld [vmem:[#allocation5 + $0x158] sm:$0xff]   ;;  %v972_v10 = vld [vmem:[#allocation5 + $0x1c0] sm:$0xff]  }
  0x2d   :  { %826 = vmatpush3.bf16.msra.mxu0 %v929_v19  ;;  %v970_v8 = vld [vmem:[#allocation5 + $0x188] sm:$0xff]   ;;  %v961_v11 = vld [vmem:[#allocation5 + $0x118] sm:$0xff]   ;;  %v963_v12 = vld [vmem:[#allocation5 + $0x150] sm:$0xff]  }
  0x2e   :  { %848 = vmatpush3.bf16.msra.mxu1 %v930_v20  ;;  %827 = vmatprep.subr.bf16.mxu0 %v931_v21  ;;  %v974_v13 = vld [vmem:[#allocation5 + $0x180] sm:$0xff]   ;;  %v965_v15 = vld [vmem:[#allocation5 + $0x110] sm:$0xff]   ;;  %v967_v16 = vld [vmem:[#allocation5 + $0x148] sm:$0xff]  }
  0x2f   :  { %849 = vmatprep.subr.bf16.mxu1 %v932_v22  ;;  %v969_v17 = vld [vmem:[#allocation5 + $0x108] sm:$0xff]   ;;  %v971_v18 = vld [vmem:[#allocation5 + $0x140] sm:$0xff]  }
  0x30   :  { %v973_v19 = vld [vmem:[#allocation5 + $0x100] sm:$0xff]  }
  0x31   :  { %828 = vmatpush3.bf16.msra.mxu0 %v933_v23  ;;  %v976_v43 = vpop.eup %975 }
  0x32   :  { %850 = vmatpush3.bf16.msra.mxu1 %v934_v24  ;;  %829 = vmatprep.subr.bf16.mxu0 %v935_v25  ;;  %v978_v45 = vpop.eup %977  ;;  %v77_v46 = vpack.c.bf16 %v976_v43, %v976_v43  ;;  %v383_v48 = vmul.f32 2.0, %v976_v43 }
  0x33   :  { %851 = vmatprep.subr.bf16.mxu1 %v936_v26  ;;  %v76_v49 = vpack.c.bf16 %v978_v45, %v978_v45  ;;  %v382_v51 = vmul.f32 2.0, %v978_v45 }
  0x34   :  { %238 = vmatprep.mubr.bf16.mxu0 %v77_v46  ;;  %v385_v53 = vmul.f32 %v976_v43, %v383_v48 }
  0x35   :  { %830 = vmatpush3.bf16.msra.mxu0 %v937_v27  ;;  %v384_v55 = vmul.f32 %v978_v45, %v382_v51 }
  0x36   :  { %852 = vmatpush3.bf16.msra.mxu1 %v938_v28  ;;  %831 = vmatprep.subr.bf16.mxu0 %v939_v29  ;;  %v784_v57 = vadd.f32 -1.0, %v385_v53 }
  0x37   :  { %853 = vmatprep.subr.bf16.mxu1 %v940_v30  ;;  %v783_v62 = vadd.f32 -1.0, %v384_v55 }
  0x38   :  { %v389_v60 = vpack.c.bf16 %v784_v57, %v784_v57  ;;  %v560_v61 = vmul.f32 %v784_v57, %v383_v48 }
  0x39   :  { %832 = vmatpush3.bf16.msra.mxu0 %v941_v31  ;;  %v559_v5 = vmul.f32 %v783_v62, %v382_v51  ;;  %v388_v20 = vpack.c.bf16 %v783_v62, %v783_v62 }
  0x3a   :  { %854 = vmatpush3.bf16.msra.mxu1 %v942_v32  ;;  %861 = vmatprep.subr.bf16.mxu0 %v943_v35  ;;  %v562_v1 = vsub.f32 %v560_v61, %v976_v43 }
  0x3b   :  { %883 = vmatprep.subr.bf16.mxu1 %v944_v36  ;;  %v561_v9 = vsub.f32 %v559_v5, %v978_v45 }
  0x3c   :  { %239 = vmatmul.mubr.bf16.vlgmr.msra.gmra.mxu0 %v76_v49  ;;  %v564_v4 = vpack.c.bf16 %v562_v1, %v562_v1 }
  0x3d   :  { %375 = vmatmul.mubr.bf16.vlgmr.msra.gmra.mxu1 %v1049_v0  ;;  %862 = vmatpush3.bf16.msra.mxu0 %v945_v42  ;;  %v955_v0 = vld [vmem:[#allocation5 + $0x160] sm:$0xff]   ;;  %v563_v14 = vpack.c.bf16 %v561_v9, %v561_v9 }
  0x3e   :  { %884 = vmatpush3.bf16.msra.mxu1 %v946_v37  ;;  %863 = vmatprep.subr.bf16.mxu0 %v947_v47 }
  0x3f   :  { %885 = vmatprep.subr.bf16.mxu1 %v948_v38  ;;  %550 = vmatprep.mubr.bf16.mxu0 %v389_v60 }
  0x40   :  { %725 = vmatprep.mubr.bf16.mxu1 %v564_v4 }
  0x41   :  { %864 = vmatpush3.bf16.msra.mxu0 %v949_v52 }
  0x42   :  { %886 = vmatpush3.bf16.msra.mxu1 %v950_v39  ;;  %865 = vmatprep.subr.bf16.mxu0 %v951_v56 }
  0x43   :  { %887 = vmatprep.subr.bf16.mxu1 %v952_v40 }
  0x45   :  { %866 = vmatpush3.bf16.msra.mxu0 %v953_v59 }
  0x46   :  { %888 = vmatpush3.bf16.msra.mxu1 %v954_v41  ;;  %867 = vmatprep.subr.bf16.mxu0 %v955_v0 }
  0x47   :  { %889 = vmatprep.subr.bf16.mxu1 %v956_v44 }
  0x49   :  { %868 = vmatpush3.bf16.msra.mxu0 %v957_v3 }
  0x4a   :  { %890 = vmatpush3.bf16.msra.mxu1 %v958_v50  ;;  %869 = vmatprep.subr.bf16.mxu0 %v959_v7 }
  0x4b   :  { %891 = vmatprep.subr.bf16.mxu1 %v960_v54 }
  0x4d   :  { %870 = vmatpush3.bf16.msra.mxu0 %v961_v11 }
  0x4e   :  { %892 = vmatpush3.bf16.msra.mxu1 %v962_v58  ;;  %871 = vmatprep.subr.bf16.mxu0 %v963_v12 }
  0x4f   :  { %893 = vmatprep.subr.bf16.mxu1 %v964_v63 }
  0x51   :  { %872 = vmatpush3.bf16.msra.mxu0 %v965_v15 }
  0x52   :  { %894 = vmatpush3.bf16.msra.mxu1 %v966_v2  ;;  %873 = vmatprep.subr.bf16.mxu0 %v967_v16 }
  0x53   :  { %895 = vmatprep.subr.bf16.mxu1 %v968_v6 }
  0x55   :  { %874 = vmatpush3.bf16.msra.mxu0 %v969_v17 }
  0x56   :  { %896 = vmatpush3.bf16.msra.mxu1 %v970_v8  ;;  %875 = vmatprep.subr.bf16.mxu0 %v971_v18 }
  0x57   :  { %897 = vmatprep.subr.bf16.mxu1 %v972_v10 }
  0x59   :  { %876 = vmatpush3.bf16.msra.mxu0 %v973_v19 }
  0x5a   :  { %898 = vmatpush3.bf16.msra.mxu1 %v974_v13 }
  0x5c   :  { %551 = vmatmul.mubr.bf16.vlgmr.msra.gmra.mxu0 %v388_v20 }
  0x5d   :  { %726 = vmatmul.mubr.bf16.vlgmr.msra.gmra.mxu1 %v563_v14 }
  0xfc   :  { %v833_v25 = vpop.f32.mrf.mxu0 }
  0xfd   :  { %v855_v21 = vpop.f32.mrf.mxu1 }
  0xfe   :  { %v834_v26 = vpop.f32.mrf.mxu0 }
  0xff   :  { %v856_v22 = vpop.f32.mrf.mxu1  ;;  %v835_v33 = vadd.f32 %v834_v26, %v833_v25 }
 0x100   :  { %v836_v27 = vpop.f32.mrf.mxu0  ;;  %v857_v34 = vadd.f32 %v856_v22, %v855_v21 }
 0x101   :  { %v858_v23 = vpop.f32.mrf.mxu1 }
 0x102   :  { %v837_v28 = vpop.f32.mrf.mxu0  ;;  %v377_v37 = vadd.f32 %v857_v34, %v835_v33 }
 0x103   :  { %v859_v24 = vpop.f32.mrf.mxu1 }
 0x11c   :  { %v877_v35 = vpop.f32.mrf.mxu0 }
 0x11d   :  { %v899_v29 = vpop.f32.mrf.mxu1 }
 0x11e   :  { %v878_v36 = vpop.f32.mrf.mxu0 }
 0x11f   :  { %v900_v30 = vpop.f32.mrf.mxu1  ;;  %v879_v38 = vadd.f32 %v878_v36, %v877_v35 }
 0x120   :  { %v880_v39 = vpop.f32.mrf.mxu0  ;;  %v901_v41 = vadd.f32 %v900_v30, %v899_v29 }
 0x121   :  { %v902_v31 = vpop.f32.mrf.mxu1  ;;  %v558_v40 = vadd.f32 %v879_v38, %v377_v37 }
 0x122   :  { %v881_v42 = vpop.f32.mrf.mxu0 }
 0x123   :  { %v903_v32 = vpop.f32.mrf.mxu1  ;;  %v733_v43 = vadd.f32 %v901_v41, %v558_v40 }
 0x125   :  { %734 = vst [vmem:[#allocation7] sm:$0xff] %v733_v43 }
 0x126   :  { %1030 = shalt.err (!%p1027_p0)
}
 0x127   :  { %744 = dma.vmem_to_hbm [thread:$0]  %s742_s1, 128, %s1079_s2, [#allocation4]  }
 0x128   :  { %1043 = dma.done.wait [#allocation4], 128  }
 0x129   :  { %1044 = vsyncadd [#allocation4], 4294967168 }
 0x12a   :  { %748 = vsyncpa [#allocation3], 1 }
 0x12b   :  { %749 = vsyncpa [#allocation6], 1 }
 0x12c   :  { %750 = vsyncpa [#allocation4], 1 }

</bundles_post_ra>
